<compile_context>
chip_gen: v5e
topology: v5e:2x2
jax: 0.10.0
libtpu: 0.0.40
codegen_flags: <defaults>
</compile_context>

<pallas_src>
import functools

import jax
import jax.numpy as jnp
from jax.experimental import pallas as pl
from jax.experimental.pallas import tpu as pltpu

LANE = 128      # vreg lane width
SUBLANE = 8     # f32 sublane count


def _round_up(n, m):
    return ((n + m - 1) // m) * m


def _mlp_kernel(x_ref, w1_ref, b1_ref, w2_ref, b2_ref, w3_ref, b3_ref, o_ref):
    # fc1 + ReLU  (bf16 MXU operands, f32 accumulation / epilogue)
    h1 = jnp.dot(x_ref[...].astype(jnp.bfloat16), w1_ref[...],
                 preferred_element_type=jnp.float32)
    h1 = jnp.maximum(h1 + b1_ref[...], 0.0)
    # fc2 + ReLU
    h2 = jnp.dot(h1.astype(jnp.bfloat16), w2_ref[...],
                 preferred_element_type=jnp.float32)
    h2 = jnp.maximum(h2 + b2_ref[...], 0.0)
    # fc3 + Sigmoid (w3/b3 are lane-padded for the MXU; slice back before the store)
    z = jnp.dot(h2.astype(jnp.bfloat16), w3_ref[...],
                preferred_element_type=jnp.float32)
    z = z + b3_ref[...]
    z = z[:, : o_ref.shape[1]]
    # exp -> EUP; exact reciprocal (EUP is otherwise idle, avoids approx error at the
    # 0.5 risk threshold).
    o_ref[...] = pl.reciprocal(1.0 + jnp.exp(-z), approx=False).astype(o_ref.dtype)


@functools.partial(jax.jit, static_argnames=("tile_b",))
def nn_risk_forward(x, w1, b1, w2, b2, w3, b3, *, tile_b=1024):
    """Fused forward pass of NN_risk as a single batch-gridded Pallas TPU kernel.

    x : (B, input_size) float32
    w1: (input_size, 512), b1: (1, 512)
    w2: (512, 256),        b2: (1, 256)
    w3: (256, output_size),b3: (1, output_size)
    returns (B, output_size) float32
    """
    B, in_size = x.shape
    h1_size = w1.shape[1]
    h2_size = w2.shape[1]
    out_size = w3.shape[1]

    # --- bf16 weights for the MXU (biases stay f32; bias/act math is f32) ---
    w1 = w1.astype(jnp.bfloat16)
    w2 = w2.astype(jnp.bfloat16)
    w3 = w3.astype(jnp.bfloat16)
    b1 = b1.astype(jnp.float32)
    b2 = b2.astype(jnp.float32)
    b3 = b3.astype(jnp.float32)

    # --- pad fc3 columns to a lane multiple for the MXU only (output itself is NOT padded;
    #     the kernel slices the logits back to out_size before the store) ---
    out_pad = _round_up(out_size, LANE)
    if out_pad != out_size:
        w3 = jnp.pad(w3, ((0, 0), (0, out_pad - out_size)))
        b3 = jnp.pad(b3, ((0, 0), (0, out_pad - out_size)))

    # --- batch tiling: sublane-aligned tile; capped so the grid has >=2 steps when B allows
    #     (lets dimension_semantics="parallel" use both v7x TensorCores). No jnp.pad of x:
    #     Pallas masks the partial last block. ---
    tb = min(int(tile_b), _round_up(pl.cdiv(B, 2), SUBLANE))
    tb = max(SUBLANE, _round_up(tb, SUBLANE))
    grid = (pl.cdiv(B, tb),)

    # Advisory cost estimate for XLA's scheduler.
    flops = 2 * B * (in_size * h1_size + h1_size * h2_size + h2_size * out_pad)
    bytes_accessed = (
        4 * B * in_size                                   # x (f32)
        + 2 * (in_size * h1_size + h1_size * h2_size + h2_size * out_pad)  # bf16 weights
        + 4 * (h1_size + h2_size + out_pad)               # f32 biases
        + 4 * B * out_size                                # output (f32)
    )
    cost = pl.CostEstimate(
        flops=flops,
        transcendentals=B * out_size,                     # exp per output element
        bytes_accessed=bytes_accessed,
    )

    def resident(shape):
        # weights/biases: same block every grid step -> DMA'd once, VMEM-resident
        return pl.BlockSpec(shape, lambda i: (0, 0))

    out = pl.pallas_call(
        _mlp_kernel,
        out_shape=jax.ShapeDtypeStruct((B, out_size), jnp.float32),
        grid=grid,
        in_specs=[
            pl.BlockSpec((tb, in_size), lambda i: (i, 0)),   # x: streamed per tile
            resident((in_size, h1_size)),                    # w1 (bf16)
            resident((1, h1_size)),                          # b1
            resident((h1_size, h2_size)),                    # w2 (bf16)
            resident((1, h2_size)),                          # b2
            resident((h2_size, out_pad)),                    # w3 (bf16, lane-padded)
            resident((1, out_pad)),                          # b3 (lane-padded)
        ],
        out_specs=pl.BlockSpec((tb, out_size), lambda i: (i, 0)),
        compiler_params=pltpu.CompilerParams(
            dimension_semantics=("parallel",),               # shard batch tiles across TCs
            vmem_limit_bytes=32 * 1024 * 1024,               # headroom for large tiles
        ),
        cost_estimate=cost,
    )(x, w1, b1, w2, b2, w3, b3)

    return out


def init_params(key, input_size, output_size):
    """Deterministic PyTorch-style (uniform +/- 1/sqrt(fan_in)) initialization."""
    keys = jax.random.split(key, 6)

    def linear(kw, kb, fan_in, fan_out):
        bound = 1.0 / jnp.sqrt(jnp.float32(fan_in))
        w = jax.random.uniform(kw, (fan_in, fan_out), jnp.float32, -bound, bound)
        b = jax.random.uniform(kb, (1, fan_out), jnp.float32, -bound, bound)
        return w, b

    w1, b1 = linear(keys[0], keys[1], input_size, 512)
    w2, b2 = linear(keys[2], keys[3], 512, 256)
    w3, b3 = linear(keys[4], keys[5], 256, output_size)
    return w1, b1, w2, b2, w3, b3


def _reference(x, w1, b1, w2, b2, w3, b3):
    h = jnp.maximum(x @ w1 + b1, 0.0)
    h = jnp.maximum(h @ w2 + b2, 0.0)
    return jax.nn.sigmoid(h @ w3 + b3)


if __name__ == "__main__":
    input_size = 32
    output_size = 4

    key = jax.random.PRNGKey(0)
    k_x, k_p, k_x2 = jax.random.split(key, 3)
    params = init_params(k_p, input_size, output_size)

    # Small "inference-like" batch (single grid step).
    batch = 8
    x = jax.random.normal(k_x, (batch, input_size), jnp.float32)
    out = jax.block_until_ready(nn_risk_forward(x, *params))
    ref = _reference(x, *params)
    assert out.shape == (batch, output_size)
    # bf16 matmuls -> looser tolerance than exact f32
    assert jnp.allclose(out, ref, atol=2e-2, rtol=2e-2), float(jnp.max(jnp.abs(out - ref)))

    # Non-multiple batch exercising the masked partial last block + multi-tile grid.
    batch2 = 300
    x2 = jax.random.normal(k_x2, (batch2, input_size), jnp.float32)
    out2 = jax.block_until_ready(nn_risk_forward(x2, *params, tile_b=128))
    ref2 = _reference(x2, *params)
    assert out2.shape == (batch2, output_size)
    assert jnp.allclose(out2, ref2, atol=2e-2, rtol=2e-2), float(jnp.max(jnp.abs(out2 - ref2)))

    print("KERNEL_OK")
</pallas_src>

<mosaic_0001>
module attributes {stable_mosaic.version = 11 : i64} {
  func.func @_mlp_kernel(%arg0: i32, %arg1: memref<8x32xf32, #tpu.memory_space<vmem>>, %arg2: memref<32x512xbf16, #tpu.memory_space<vmem>>, %arg3: memref<1x512xf32, #tpu.memory_space<vmem>>, %arg4: memref<512x256xbf16, #tpu.memory_space<vmem>>, %arg5: memref<1x256xf32, #tpu.memory_space<vmem>>, %arg6: memref<256x128xbf16, #tpu.memory_space<vmem>>, %arg7: memref<1x128xf32, #tpu.memory_space<vmem>>, %arg8: memref<8x4xf32, #tpu.memory_space<vmem>>) attributes {dimension_semantics = [#tpu.dimension_semantics<parallel>], iteration_bounds = array<i64: 1>, scalar_prefetch = 0 : i64, scratch_operands = 0 : i64, tpu.core_type = #tpu.core_type<tc>, window_params = [{transform_indices = @transform_0, window_bounds = array<i64: 8, 32>}, {pipeline_mode = #tpu.pipeline_mode<synchronous>, transform_indices = @transform_1, window_bounds = array<i64: 32, 512>}, {pipeline_mode = #tpu.pipeline_mode<synchronous>, transform_indices = @transform_2, window_bounds = array<i64: 1, 512>}, {pipeline_mode = #tpu.pipeline_mode<synchronous>, transform_indices = @transform_3, window_bounds = array<i64: 512, 256>}, {pipeline_mode = #tpu.pipeline_mode<synchronous>, transform_indices = @transform_4, window_bounds = array<i64: 1, 256>}, {pipeline_mode = #tpu.pipeline_mode<synchronous>, transform_indices = @transform_5, window_bounds = array<i64: 256, 128>}, {pipeline_mode = #tpu.pipeline_mode<synchronous>, transform_indices = @transform_6, window_bounds = array<i64: 1, 128>}, {transform_indices = @transform_7, window_bounds = array<i64: 8, 4>}]} {
    %c0 = arith.constant 0 : index
    %c0_0 = arith.constant 0 : index
    %0 = vector.load %arg1[%c0, %c0_0] : memref<8x32xf32, #tpu.memory_space<vmem>>, vector<8x32xf32>
    %1 = arith.truncf %0 : vector<8x32xf32> to vector<8x32xbf16>
    %c0_1 = arith.constant 0 : index
    %c0_2 = arith.constant 0 : index
    %2 = vector.load %arg2[%c0_1, %c0_2] : memref<32x512xbf16, #tpu.memory_space<vmem>>, vector<32x512xbf16>
    %cst = arith.constant dense<0.000000e+00> : vector<8x512xf32>
    %3 = tpu.matmul %1, %2, %cst {dimension_numbers = #tpu.dot_dimension_numbers<[1], [0], [0], [1], [0, 0, 1, 1], [], []>} : vector<8x32xbf16>, vector<32x512xbf16>, vector<8x512xf32> -> vector<8x512xf32>
    %c0_3 = arith.constant 0 : index
    %c0_4 = arith.constant 0 : index
    %4 = vector.load %arg3[%c0_3, %c0_4] : memref<1x512xf32, #tpu.memory_space<vmem>>, vector<1x512xf32>
    %5 = vector.broadcast %4 : vector<1x512xf32> to vector<8x512xf32>
    %6 = arith.addf %3, %5 : vector<8x512xf32>
    %cst_5 = arith.constant 0.000000e+00 : f32
    %7 = vector.broadcast %cst_5 : f32 to vector<8x512xf32>
    %8 = arith.maximumf %6, %7 : vector<8x512xf32>
    %9 = arith.truncf %8 : vector<8x512xf32> to vector<8x512xbf16>
    %c0_6 = arith.constant 0 : index
    %c0_7 = arith.constant 0 : index
    %10 = vector.load %arg4[%c0_6, %c0_7] : memref<512x256xbf16, #tpu.memory_space<vmem>>, vector<512x256xbf16>
    %cst_8 = arith.constant dense<0.000000e+00> : vector<8x256xf32>
    %11 = tpu.matmul %9, %10, %cst_8 {dimension_numbers = #tpu.dot_dimension_numbers<[1], [0], [0], [1], [0, 0, 1, 1], [], []>} : vector<8x512xbf16>, vector<512x256xbf16>, vector<8x256xf32> -> vector<8x256xf32>
    %c0_9 = arith.constant 0 : index
    %c0_10 = arith.constant 0 : index
    %12 = vector.load %arg5[%c0_9, %c0_10] : memref<1x256xf32, #tpu.memory_space<vmem>>, vector<1x256xf32>
    %13 = vector.broadcast %12 : vector<1x256xf32> to vector<8x256xf32>
    %14 = arith.addf %11, %13 : vector<8x256xf32>
    %cst_11 = arith.constant 0.000000e+00 : f32
    %15 = vector.broadcast %cst_11 : f32 to vector<8x256xf32>
    %16 = arith.maximumf %14, %15 : vector<8x256xf32>
    %17 = arith.truncf %16 : vector<8x256xf32> to vector<8x256xbf16>
    %c0_12 = arith.constant 0 : index
    %c0_13 = arith.constant 0 : index
    %18 = vector.load %arg6[%c0_12, %c0_13] : memref<256x128xbf16, #tpu.memory_space<vmem>>, vector<256x128xbf16>
    %cst_14 = arith.constant dense<0.000000e+00> : vector<8x128xf32>
    %19 = tpu.matmul %17, %18, %cst_14 {dimension_numbers = #tpu.dot_dimension_numbers<[1], [0], [0], [1], [0, 0, 1, 1], [], []>} : vector<8x256xbf16>, vector<256x128xbf16>, vector<8x128xf32> -> vector<8x128xf32>
    %c0_15 = arith.constant 0 : index
    %c0_16 = arith.constant 0 : index
    %20 = vector.load %arg7[%c0_15, %c0_16] : memref<1x128xf32, #tpu.memory_space<vmem>>, vector<1x128xf32>
    %21 = vector.broadcast %20 : vector<1x128xf32> to vector<8x128xf32>
    %22 = arith.addf %19, %21 : vector<8x128xf32>
    %23 = vector.extract_strided_slice %22 {offsets = [0, 0], sizes = [8, 4], strides = [1, 1]} : vector<8x128xf32> to vector<8x4xf32>
    %cst_17 = arith.constant 0.000000e+00 : f32
    %24 = vector.broadcast %cst_17 : f32 to vector<8x4xf32>
    %25 = arith.subf %24, %23 : vector<8x4xf32>
    %26 = math.exp %25 : vector<8x4xf32>
    %cst_18 = arith.constant 1.000000e+00 : f32
    %27 = vector.broadcast %cst_18 : f32 to vector<8x4xf32>
    %28 = arith.addf %27, %26 : vector<8x4xf32>
    %29 = tpu.reciprocal %28 : vector<8x4xf32> -> vector<8x4xf32>
    %c0_19 = arith.constant 0 : index
    %c0_20 = arith.constant 0 : index
    %30 = vector.load %arg8[%c0_19, %c0_20] : memref<8x4xf32, #tpu.memory_space<vmem>>, vector<8x4xf32>
    tpu.vector_store %arg8[%c0_19, %c0_20], %29 {strides = array<i32>} : memref<8x4xf32, #tpu.memory_space<vmem>>, vector<8x4xf32>,
    return
  }
  func.func @transform_0(%arg0: i32) -> (i32, i32) {
    %c0_i32 = arith.constant 0 : i32
    %c0_i32_0 = arith.constant 0 : i32
    return %arg0, %c0_i32 : i32, i32
  }
  func.func @transform_1(%arg0: i32) -> (i32, i32) {
    %c0_i32 = arith.constant 0 : i32
    %c0_i32_0 = arith.constant 0 : i32
    %c0_i32_1 = arith.constant 0 : i32
    return %c0_i32, %c0_i32_0 : i32, i32
  }
  func.func @transform_2(%arg0: i32) -> (i32, i32) {
    %c0_i32 = arith.constant 0 : i32
    %c0_i32_0 = arith.constant 0 : i32
    %c0_i32_1 = arith.constant 0 : i32
    return %c0_i32, %c0_i32_0 : i32, i32
  }
  func.func @transform_3(%arg0: i32) -> (i32, i32) {
    %c0_i32 = arith.constant 0 : i32
    %c0_i32_0 = arith.constant 0 : i32
    %c0_i32_1 = arith.constant 0 : i32
    return %c0_i32, %c0_i32_0 : i32, i32
  }
  func.func @transform_4(%arg0: i32) -> (i32, i32) {
    %c0_i32 = arith.constant 0 : i32
    %c0_i32_0 = arith.constant 0 : i32
    %c0_i32_1 = arith.constant 0 : i32
    return %c0_i32, %c0_i32_0 : i32, i32
  }
  func.func @transform_5(%arg0: i32) -> (i32, i32) {
    %c0_i32 = arith.constant 0 : i32
    %c0_i32_0 = arith.constant 0 : i32
    %c0_i32_1 = arith.constant 0 : i32
    return %c0_i32, %c0_i32_0 : i32, i32
  }
  func.func @transform_6(%arg0: i32) -> (i32, i32) {
    %c0_i32 = arith.constant 0 : i32
    %c0_i32_0 = arith.constant 0 : i32
    %c0_i32_1 = arith.constant 0 : i32
    return %c0_i32, %c0_i32_0 : i32, i32
  }
  func.func @transform_7(%arg0: i32) -> (i32, i32) {
    %c0_i32 = arith.constant 0 : i32
    %c0_i32_0 = arith.constant 0 : i32
    return %arg0, %c0_i32 : i32, i32
  }
}

</mosaic_0001>

<bundles_post_ra>
// kernel: nn_risk_forward.1
= control target key start
LH: loop header
LB: loop body
LE: loop exit
PB: predicated region body
PF: predicated region fallthrough
CT: control target
= control target key end

     0   :  { %vm87_vm0 = vcmask 261120   ;;  %vm825_vm4 = vcmask 31744   ;;  %s1825_s1 = inlined_call_operand.vmem [shape: bf16[32,512], index: 1, kind: input, shape index: {}]   ;;  %s1826_s0 = inlined_call_operand.vmem [shape: f32[8,32], index: 0, kind: input, shape index: {}]   ;;  %s1827_s3 = inlined_call_operand.vmem [shape: bf16[512,256], index: 3, kind: input, shape index: {}]   ;;  %s1828_s2 = inlined_call_operand.vmem [shape: f32[1,512], index: 2, kind: input, shape index: {}]   ;;  %s1829_s6 = inlined_call_operand.vmem [shape: f32[1,128], index: 6, kind: input, shape index: {}]   ;;  %s1830_s5 = inlined_call_operand.vmem [shape: bf16[256,128], index: 5, kind: input, shape index: {}]   ;;  %s1831_s4 = inlined_call_operand.vmem [shape: f32[1,256], index: 4, kind: input, shape index: {}]   ;;  %s1832_s7 = inlined_call_operand.vmem [shape: f32[8,4], index: 7, kind: output, shape index: {}]  }
   0x1   :  { %v849_v0 = vld [vmem:[%s1825_s1 + $0x20] sm:$0xf]  ;;  %v1193_v1 = vld [vmem:[%s1825_s1 + $0x2c] sm:$0xf0]  ;;  %v1191_v2 = vld [vmem:[%s1825_s1 + $0x24] sm:$0xf] }
   0x2   :  { %v850_v3 = vor.u32 %v1193_v1, %v849_v0  ;;  %v851_v4 = vld [vmem:[%s1825_s1 + $0x30] sm:$0xf0]  ;;  %v833_v5 = vld [vmem:[%s1825_s1] sm:$0xf]  ;;  %v1189_v6 = vld [vmem:[%s1825_s1 + $0xc] sm:$0xf0] }
   0x3   :  { %v854_v7 = vor.u32 %v1191_v2, %v851_v4  ;;  %v1187_v8 = vld [vmem:[%s1825_s1 + $0x4] sm:$0xf]  ;;  %v835_v9 = vld [vmem:[%s1825_s1 + $0x10] sm:$0xf0]  ;;  %v834_v11 = vor.u32 %v1189_v6, %v833_v5  ;;  %v857_v12 = vld [vmem:[%s1825_s1 + $0x28] sm:$0xf] }
   0x4   :  { %v27_v10 = vld [vmem:[%s1826_s0] sm:$0xff]  ;;  %97 = vmatpush.bf16.msra.mxu2 %v850_v3  ;;  %v1194_v13 = vld [vmem:[%s1825_s1 + $0x34] sm:$0xf0]  ;;  %v1192_v14 = vld [vmem:[%s1825_s1 + $0x2c] sm:$0xf]  ;;  %v838_v15 = vor.u32 %v1187_v8, %v835_v9 }
   0x5   :  { %110 = vmatpush.bf16.msra.mxu3 %v854_v7  ;;  %v858_v16 = vor.u32 %v1194_v13, %v857_v12  ;;  %v859_v17 = vld [vmem:[%s1825_s1 + $0x38] sm:$0xf0]  ;;  %v841_v18 = vld [vmem:[%s1825_s1 + $0x8] sm:$0xf]  ;;  %v1190_v19 = vld [vmem:[%s1825_s1 + $0x14] sm:$0xf0]  ;;  %v1374_v24 = vpack.c.bf16 %v27_v10, %v27_v10 }
   0x6   :  { %v862_v20 = vor.u32 %v1192_v14, %v859_v17  ;;  %v1188_v21 = vld [vmem:[%s1825_s1 + $0xc] sm:$0xf]  ;;  %v843_v22 = vld [vmem:[%s1825_s1 + $0x18] sm:$0xf0]  ;;  %v925_v23 = vld [vmem:[%s1827_s3 + $0x70] sm:$0xf]  ;;  %v842_v33 = vor.u32 %v1190_v19, %v841_v18 }
   0x7   :  { %v1210_v25 = vld [vmem:[%s1827_s3 + $0x74] sm:$0xf0]  ;;  %v989_v26 = vld [vmem:[%s1827_s3 + $0xf0] sm:$0xf]  ;;  %v917_v30 = vld [vmem:[%s1827_s3 + $0x60] sm:$0xf]  ;;  %v846_v35 = vor.u32 %v1188_v21, %v843_v22 }
   0x8   :  { %v1226_v27 = vld [vmem:[%s1827_s3 + $0xf4] sm:$0xf0]  ;;  %98 = vmatpush.bf16.msra.mxu2 %v834_v11  ;;  %v926_v28 = vor.u32 %v1210_v25, %v925_v23  ;;  %v1208_v31 = vld [vmem:[%s1827_s3 + $0x64] sm:$0xf0]  ;;  %v981_v32 = vld [vmem:[%s1827_s3 + $0xe0] sm:$0xf] }
   0x9   :  { %v990_v29 = vor.u32 %v1226_v27, %v989_v26  ;;  %111 = vmatpush.bf16.msra.mxu3 %v838_v15  ;;  %v1224_v34 = vld [vmem:[%s1827_s3 + $0xe4] sm:$0xf0]  ;;  %v918_v36 = vor.u32 %v1208_v31, %v917_v30  ;;  %v909_v38 = vld [vmem:[%s1827_s3 + $0x50] sm:$0xf]  ;;  %v1206_v39 = vld [vmem:[%s1827_s3 + $0x54] sm:$0xf0] }
   0xa   :  { %541 = vmatpush.bf16.msra.mxu0 %v926_v28  ;;  %v982_v37 = vor.u32 %v1224_v34, %v981_v32  ;;  %v973_v40 = vld [vmem:[%s1827_s3 + $0xd0] sm:$0xf]  ;;  %v1222_v41 = vld [vmem:[%s1827_s3 + $0xd4] sm:$0xf0]  ;;  %v910_v44 = vor.u32 %v1206_v39, %v909_v38  ;;  %v901_v45 = vld [vmem:[%s1827_s3 + $0x40] sm:$0xf] }
   0xb   :  { %863 = vmatmul.msk.bf16.vlgmr.msra.gmra.mxu2 %vm87_vm0, %v1374_v24  ;;  %554 = vmatpush.bf16.msra.mxu1 %v990_v29  ;;  %v1053_v42 = vld [vmem:[%s1827_s3 + $0x170] sm:$0xf]  ;;  %v1242_v43 = vld [vmem:[%s1827_s3 + $0x174] sm:$0xf0]  ;;  %v974_v49 = vor.u32 %v1222_v41, %v973_v40  ;;  %v1204_v50 = vld [vmem:[%s1827_s3 + $0x44] sm:$0xf0] }
   0xc   :  { %123 = vmatpush.bf16.msrb.mxu2 %v858_v16  ;;  %864 = vmatmul.msk.bf16.vlgmr.msra.gmra.mxu3 %vm87_vm0, %v1374_v24  ;;  %v1054_v46 = vor.u32 %v1242_v43, %v1053_v42  ;;  %v1117_v47 = vld [vmem:[%s1827_s3 + $0x1f0] sm:$0xf]  ;;  %v1258_v48 = vld [vmem:[%s1827_s3 + $0x1f4] sm:$0xf0]  ;;  %v965_v51 = vld [vmem:[%s1827_s3 + $0xc0] sm:$0xf]  ;;  %v902_v59 = vor.u32 %v1204_v50, %v901_v45 }
   0xd   :  { %136 = vmatpush.bf16.msrb.mxu3 %v862_v20  ;;  %v1220_v52 = vld [vmem:[%s1827_s3 + $0xc4] sm:$0xf0]  ;;  %v1118_v53 = vor.u32 %v1258_v48, %v1117_v47  ;;  %v1045_v54 = vld [vmem:[%s1827_s3 + $0x160] sm:$0xf]  ;;  %v893_v60 = vld [vmem:[%s1827_s3 + $0x30] sm:$0xf] }
   0xe   :  { %542 = vmatpush.bf16.msra.mxu0 %v918_v36  ;;  %v1240_v55 = vld [vmem:[%s1827_s3 + $0x164] sm:$0xf0]  ;;  %v1109_v56 = vld [vmem:[%s1827_s3 + $0x1e0] sm:$0xf]  ;;  %v1202_v61 = vld [vmem:[%s1827_s3 + $0x34] sm:$0xf0]  ;;  %v966_v0 = vor.u32 %v1220_v52, %v965_v51 }
   0xf   :  { %555 = vmatpush.bf16.msra.mxu1 %v982_v37  ;;  %v1046_v57 = vor.u32 %v1240_v55, %v1045_v54  ;;  %v1256_v58 = vld [vmem:[%s1827_s3 + $0x1e4] sm:$0xf0]  ;;  %v1037_v63 = vld [vmem:[%s1827_s3 + $0x150] sm:$0xf]  ;;  %v1238_v1 = vld [vmem:[%s1827_s3 + $0x154] sm:$0xf0]  ;;  %v894_v10 = vor.u32 %v1202_v61, %v893_v60 }
  0x10   :  { %124 = vmatpush.bf16.msrb.mxu2 %v842_v33  ;;  %v1110_v62 = vor.u32 %v1256_v58, %v1109_v56  ;;  %v1101_v2 = vld [vmem:[%s1827_s3 + $0x1d0] sm:$0xf]  ;;  %v1254_v3 = vld [vmem:[%s1827_s3 + $0x1d4] sm:$0xf0]  ;;  %v1038_v6 = vor.u32 %v1238_v1, %v1037_v63  ;;  %v1029_v8 = vld [vmem:[%s1827_s3 + $0x140] sm:$0xf] }
  0x11   :  { %137 = vmatpush.bf16.msrb.mxu3 %v846_v35  ;;  %v957_v4 = vld [vmem:[%s1827_s3 + $0xb0] sm:$0xf]  ;;  %v1218_v5 = vld [vmem:[%s1827_s3 + $0xb4] sm:$0xf0]  ;;  %v1102_v7 = vor.u32 %v1254_v3, %v1101_v2  ;;  %v1236_v9 = vld [vmem:[%s1827_s3 + $0x144] sm:$0xf0] }
  0x12   :  { %543 = vmatpush.bf16.msra.mxu0 %v910_v44  ;;  %v1093_v11 = vld [vmem:[%s1827_s3 + $0x1c0] sm:$0xf]  ;;  %v1252_v12 = vld [vmem:[%s1827_s3 + $0x1c4] sm:$0xf0]  ;;  %v958_v13 = vor.u32 %v1218_v5, %v957_v4  ;;  %v1030_v18 = vor.u32 %v1236_v9, %v1029_v8  ;;  %v1021_v20 = vld [vmem:[%s1827_s3 + $0x130] sm:$0xf] }
  0x13   :  { %556 = vmatpush.bf16.msra.mxu1 %v974_v49  ;;  %v885_v14 = vld [vmem:[%s1827_s3 + $0x20] sm:$0xf]  ;;  %v1200_v15 = vld [vmem:[%s1827_s3 + $0x24] sm:$0xf0]  ;;  %v1094_v19 = vor.u32 %v1252_v12, %v1093_v11  ;;  %v1234_v21 = vld [vmem:[%s1827_s3 + $0x134] sm:$0xf0] }
  0x14   :  { %567 = vmatpush.bf16.msra.mxu2 %v1054_v46  ;;  %v949_v16 = vld [vmem:[%s1827_s3 + $0xa0] sm:$0xf]  ;;  %v1216_v17 = vld [vmem:[%s1827_s3 + $0xa4] sm:$0xf0]  ;;  %v886_v22 = vor.u32 %v1200_v15, %v885_v14  ;;  %v1085_v23 = vld [vmem:[%s1827_s3 + $0x1b0] sm:$0xf]  ;;  %v1022_v31 = vor.u32 %v1234_v21, %v1021_v20 }
  0x15   :  { %580 = vmatpush.bf16.msra.mxu3 %v1118_v53  ;;  %v1250_v25 = vld [vmem:[%s1827_s3 + $0x1b4] sm:$0xf0]  ;;  %v950_v26 = vor.u32 %v1216_v17, %v949_v16  ;;  %v877_v27 = vld [vmem:[%s1827_s3 + $0x10] sm:$0xf]  ;;  %v1013_v33 = vld [vmem:[%s1827_s3 + $0x120] sm:$0xf] }
  0x16   :  { %544 = vmatpush.bf16.msra.mxu0 %v902_v59  ;;  %v1198_v28 = vld [vmem:[%s1827_s3 + $0x14] sm:$0xf0]  ;;  %v941_v29 = vld [vmem:[%s1827_s3 + $0x90] sm:$0xf]  ;;  %v1086_v32 = vor.u32 %v1250_v25, %v1085_v23  ;;  %v1077_v35 = vld [vmem:[%s1827_s3 + $0x1a0] sm:$0xf] }
  0x17   :  { %557 = vmatpush.bf16.msra.mxu1 %v966_v0  ;;  %v1214_v30 = vld [vmem:[%s1827_s3 + $0x94] sm:$0xf0]  ;;  %v878_v34 = vor.u32 %v1198_v28, %v877_v27  ;;  %v1248_v36 = vld [vmem:[%s1827_s3 + $0x1a4] sm:$0xf0]  ;;  %v869_v38 = vld [vmem:[%s1827_s3] sm:$0xf] }
  0x18   :  { %568 = vmatpush.bf16.msra.mxu2 %v1046_v57  ;;  %v942_v37 = vor.u32 %v1214_v30, %v941_v29  ;;  %v1196_v39 = vld [vmem:[%s1827_s3 + $0x4] sm:$0xf0]  ;;  %v933_v40 = vld [vmem:[%s1827_s3 + $0x80] sm:$0xf]  ;;  %v1209_v42 = vld [vmem:[%s1827_s3 + $0x74] sm:$0xf]  ;;  %v1078_v47 = vor.u32 %v1248_v36, %v1077_v35 }
  0x19   :  { %581 = vmatpush.bf16.msra.mxu3 %v1110_v62  ;;  %v1212_v41 = vld [vmem:[%s1827_s3 + $0x84] sm:$0xf0]  ;;  %v927_v43 = vld [vmem:[%s1827_s3 + $0x78] sm:$0xf0]  ;;  %v1225_v45 = vld [vmem:[%s1827_s3 + $0xf4] sm:$0xf]  ;;  %v870_v48 = vor.u32 %v1196_v39, %v869_v38 }
  0x1a   :  { %545 = vmatpush.bf16.msra.mxu0 %v894_v10  ;;  %v991_v46 = vld [vmem:[%s1827_s3 + $0xf8] sm:$0xf0]  ;;  %v934_v49 = vor.u32 %v1212_v41, %v933_v40  ;;  %v930_v50 = vor.u32 %v1209_v42, %v927_v43  ;;  %v1207_v52 = vld [vmem:[%s1827_s3 + $0x64] sm:$0xf]  ;;  %v919_v53 = vld [vmem:[%s1827_s3 + $0x68] sm:$0xf0] }
  0x1b   :  { %865 = vmatmul.msk.bf16.vlgmr.msrb.gmra.mxu2 %vm87_vm0, %v1374_v24  ;;  %558 = vmatpush.bf16.msra.mxu1 %v958_v13  ;;  %v994_v51 = vor.u32 %v1225_v45, %v991_v46  ;;  %v1223_v54 = vld [vmem:[%s1827_s3 + $0xe4] sm:$0xf]  ;;  %v983_v55 = vld [vmem:[%s1827_s3 + $0xe8] sm:$0xf0]  ;;  %v922_v56 = vor.u32 %v1207_v52, %v919_v53  ;;  %v1205_v58 = vld [vmem:[%s1827_s3 + $0x54] sm:$0xf] }
  0x1c   :  { %569 = vmatpush.bf16.msra.mxu2 %v1038_v6  ;;  %866 = vmatmul.msk.bf16.vlgmr.msrb.gmra.mxu3 %vm87_vm0, %v1374_v24  ;;  %v1232_v24 = vld [vmem:[%s1827_s3 + $0x124] sm:$0xf0]  ;;  %v986_v57 = vor.u32 %v1223_v54, %v983_v55  ;;  %v911_v59 = vld [vmem:[%s1827_s3 + $0x58] sm:$0xf0]  ;;  %v1221_v60 = vld [vmem:[%s1827_s3 + $0xd4] sm:$0xf] }
  0x1d   :  { %582 = vmatpush.bf16.msra.mxu3 %v1102_v7  ;;  %v1014_v44 = vor.u32 %v1232_v24, %v1013_v33  ;;  %v914_v61 = vor.u32 %v1205_v58, %v911_v59  ;;  %v975_v62 = vld [vmem:[%s1827_s3 + $0xd8] sm:$0xf0]  ;;  %v1005_v0 = vld [vmem:[%s1827_s3 + $0x110] sm:$0xf]  ;;  %v1230_v1 = vld [vmem:[%s1827_s3 + $0x114] sm:$0xf0] }
  0x1e   :  { %546 = vmatpush.bf16.msra.mxu0 %v886_v22  ;;  %v978_v63 = vor.u32 %v1221_v60, %v975_v62  ;;  %v1069_v2 = vld [vmem:[%s1827_s3 + $0x190] sm:$0xf]  ;;  %v1006_v3 = vor.u32 %v1230_v1, %v1005_v0  ;;  %v1246_v4 = vld [vmem:[%s1827_s3 + $0x194] sm:$0xf0]  ;;  %v1203_v5 = vld [vmem:[%s1827_s3 + $0x44] sm:$0xf] }
  0x1f   :  { %559 = vmatpush.bf16.msra.mxu1 %v950_v26  ;;  %v903_v6 = vld [vmem:[%s1827_s3 + $0x48] sm:$0xf0]  ;;  %v1070_v7 = vor.u32 %v1246_v4, %v1069_v2  ;;  %v1219_v9 = vld [vmem:[%s1827_s3 + $0xc4] sm:$0xf]  ;;  %v997_v12 = vld [vmem:[%s1827_s3 + $0x100] sm:$0xf] }
  0x20   :  { %570 = vmatpush.bf16.msra.mxu2 %v1030_v18  ;;  %v906_v8 = vor.u32 %v1203_v5, %v903_v6  ;;  %v967_v10 = vld [vmem:[%s1827_s3 + $0xc8] sm:$0xf0]  ;;  %v1228_v13 = vld [vmem:[%s1827_s3 + $0x104] sm:$0xf0]  ;;  %v1061_v14 = vld [vmem:[%s1827_s3 + $0x180] sm:$0xf] }
  0x21   :  { %583 = vmatpush.bf16.msra.mxu3 %v1094_v19  ;;  %v970_v11 = vor.u32 %v1219_v9, %v967_v10  ;;  %v998_v15 = vor.u32 %v1228_v13, %v997_v12  ;;  %v1244_v16 = vld [vmem:[%s1827_s3 + $0x184] sm:$0xf0]  ;;  %v1201_v17 = vld [vmem:[%s1827_s3 + $0x34] sm:$0xf]  ;;  %v895_v18 = vld [vmem:[%s1827_s3 + $0x38] sm:$0xf0] }
  0x22   :  { %547 = vmatpush.bf16.msra.mxu0 %v878_v34  ;;  %v1062_v19 = vor.u32 %v1244_v16, %v1061_v14  ;;  %v898_v20 = vor.u32 %v1201_v17, %v895_v18  ;;  %v1217_v21 = vld [vmem:[%s1827_s3 + $0xb4] sm:$0xf]  ;;  %v959_v22 = vld [vmem:[%s1827_s3 + $0xb8] sm:$0xf0]  ;;  %v1215_v33 = vld [vmem:[%s1827_s3 + $0xa4] sm:$0xf] }
  0x23   :  { %560 = vmatpush.bf16.msra.mxu1 %v942_v37  ;;  %v1241_v23 = vld [vmem:[%s1827_s3 + $0x174] sm:$0xf]  ;;  %v962_v25 = vor.u32 %v1217_v21, %v959_v22  ;;  %v1055_v26 = vld [vmem:[%s1827_s3 + $0x178] sm:$0xf0]  ;;  %v951_v34 = vld [vmem:[%s1827_s3 + $0xa8] sm:$0xf0] }
  0x24   :  { %571 = vmatpush.bf16.msra.mxu2 %v1022_v31  ;;  %v1257_v27 = vld [vmem:[%s1827_s3 + $0x1f4] sm:$0xf]  ;;  %v1119_v28 = vld [vmem:[%s1827_s3 + $0x1f8] sm:$0xf0]  ;;  %v1058_v29 = vor.u32 %v1241_v23, %v1055_v26  ;;  %v1199_v31 = vld [vmem:[%s1827_s3 + $0x24] sm:$0xf]  ;;  %v954_v37 = vor.u32 %v1215_v33, %v951_v34 }
  0x25   :  { %584 = vmatpush.bf16.msra.mxu3 %v1086_v32  ;;  %v1122_v30 = vor.u32 %v1257_v27, %v1119_v28  ;;  %v887_v32 = vld [vmem:[%s1827_s3 + $0x28] sm:$0xf0]  ;;  %v1239_v35 = vld [vmem:[%s1827_s3 + $0x164] sm:$0xf]  ;;  %v1197_v42 = vld [vmem:[%s1827_s3 + $0x14] sm:$0xf] }
  0x26   :  { %548 = vmatpush.bf16.msra.mxu0 %v870_v48  ;;  %v890_v24 = vor.u32 %v1199_v31, %v887_v32  ;;  %v1047_v36 = vld [vmem:[%s1827_s3 + $0x168] sm:$0xf0]  ;;  %v1255_v39 = vld [vmem:[%s1827_s3 + $0x1e4] sm:$0xf]  ;;  %v879_v43 = vld [vmem:[%s1827_s3 + $0x18] sm:$0xf0] }
  0x27   :  { %561 = vmatpush.bf16.msra.mxu1 %v934_v49  ;;  %v1050_v38 = vor.u32 %v1239_v35, %v1047_v36  ;;  %v1111_v40 = vld [vmem:[%s1827_s3 + $0x1e8] sm:$0xf0]  ;;  %v882_v45 = vor.u32 %v1197_v42, %v879_v43  ;;  %v943_v46 = vld [vmem:[%s1827_s3 + $0x98] sm:$0xf0]  ;;  %v1195_v54 = vld [vmem:[%s1827_s3 + $0x4] sm:$0xf] }
  0x28   :  { %572 = vmatpush.bf16.msra.mxu2 %v1014_v44  ;;  %v1114_v41 = vor.u32 %v1255_v39, %v1111_v40  ;;  %v1213_v44 = vld [vmem:[%s1827_s3 + $0x94] sm:$0xf]  ;;  %v1039_v48 = vld [vmem:[%s1827_s3 + $0x158] sm:$0xf0]  ;;  %v871_v55 = vld [vmem:[%s1827_s3 + $0x8] sm:$0xf0] }
  0x29   :  { %585 = vmatpush.bf16.msra.mxu3 %v1078_v47  ;;  %v1237_v47 = vld [vmem:[%s1827_s3 + $0x154] sm:$0xf]  ;;  %v946_v49 = vor.u32 %v1213_v44, %v943_v46  ;;  %v1103_v52 = vld [vmem:[%s1827_s3 + $0x1d8] sm:$0xf0]  ;;  %v935_v58 = vld [vmem:[%s1827_s3 + $0x88] sm:$0xf0] }
  0x2a   :  { %593 = vmatpush.bf16.msrb.mxu0 %v930_v50  ;;  %v1042_v50 = vor.u32 %v1237_v47, %v1039_v48  ;;  %v1235_v59 = vld [vmem:[%s1827_s3 + $0x144] sm:$0xf]  ;;  %v1031_v60 = vld [vmem:[%s1827_s3 + $0x148] sm:$0xf0]  ;;  %v1233_v2 = vld [vmem:[%s1827_s3 + $0x134] sm:$0xf] }
  0x2b   :  { %606 = vmatpush.bf16.msrb.mxu1 %v994_v51  ;;  %v1253_v51 = vld [vmem:[%s1827_s3 + $0x1d4] sm:$0xf]  ;;  %v1034_v62 = vor.u32 %v1235_v59, %v1031_v60  ;;  %v1095_v0 = vld [vmem:[%s1827_s3 + $0x1c8] sm:$0xf0]  ;;  %v1087_v6 = vld [vmem:[%s1827_s3 + $0x1b8] sm:$0xf0] }
  0x2c   :  { %573 = vmatpush.bf16.msra.mxu2 %v1006_v3  ;;  %v1106_v53 = vor.u32 %v1253_v51, %v1103_v52  ;;  %v1023_v3 = vld [vmem:[%s1827_s3 + $0x138] sm:$0xf0]  ;;  %v1249_v4 = vld [vmem:[%s1827_s3 + $0x1b4] sm:$0xf]  ;;  %v1015_v9 = vld [vmem:[%s1827_s3 + $0x128] sm:$0xf0] }
  0x2d   :  { %586 = vmatpush.bf16.msra.mxu3 %v1070_v7  ;;  %v1026_v5 = vor.u32 %v1233_v2, %v1023_v3  ;;  %v1090_v7 = vor.u32 %v1249_v4, %v1087_v6  ;;  %v1247_v10 = vld [vmem:[%s1827_s3 + $0x1a4] sm:$0xf]  ;;  %v1079_v12 = vld [vmem:[%s1827_s3 + $0x1a8] sm:$0xf0]  ;;  %v1007_v16 = vld [vmem:[%s1827_s3 + $0x118] sm:$0xf0] }
  0x2e   :  { %594 = vmatpush.bf16.msrb.mxu0 %v922_v56  ;;  %v1211_v56 = vld [vmem:[%s1827_s3 + $0x84] sm:$0xf]  ;;  %v1082_v14 = vor.u32 %v1247_v10, %v1079_v12  ;;  %v1245_v17 = vld [vmem:[%s1827_s3 + $0x194] sm:$0xf]  ;;  %v1071_v18 = vld [vmem:[%s1827_s3 + $0x198] sm:$0xf0] }
  0x2f   :  { %607 = vmatpush.bf16.msrb.mxu1 %v986_v57  ;;  %v874_v57 = vor.u32 %v1195_v54, %v871_v55  ;;  %v1074_v22 = vor.u32 %v1245_v17, %v1071_v18  ;;  %v999_v26 = vld [vmem:[%s1827_s3 + $0x108] sm:$0xf0]  ;;  %v1266_v51 = vld [vmem:[%s1830_s5 + $0x38] sm:$0xff]  ;;  %v1265_v52 = vld [vmem:[%s1830_s5 + $0x30] sm:$0xff] }
  0x30   :  { %574 = vmatpush.bf16.msra.mxu2 %v998_v15  ;;  %v1229_v15 = vld [vmem:[%s1827_s3 + $0x114] sm:$0xf]  ;;  %v1263_v54 = vld [vmem:[%s1830_s5 + $0x20] sm:$0xff]  ;;  %v1262_v55 = vld [vmem:[%s1830_s5 + $0x18] sm:$0xff] }
  0x31   :  { %587 = vmatpush.bf16.msra.mxu3 %v1062_v19  ;;  %v1010_v21 = vor.u32 %v1229_v15, %v1007_v16  ;;  %v1260_v59 = vld [vmem:[%s1830_s5 + $0x8] sm:$0xff]  ;;  %v1269_v2 = vld [vmem:[%s1830_s5 + $0x50] sm:$0xff]  ;;  %v215_v6 = vld [vmem:[%s1831_s4] sm:$0x3] }
  0x32   :  { %595 = vmatpush.bf16.msrb.mxu0 %v914_v61  ;;  %v938_v61 = vor.u32 %v1211_v56, %v935_v58  ;;  %v1274_v56 = vld [vmem:[%s1830_s5 + $0x78] sm:$0xff]  ;;  %v1273_v58 = vld [vmem:[%s1830_s5 + $0x70] sm:$0xff]  ;;  %v1272_v60 = vld [vmem:[%s1830_s5 + $0x68] sm:$0xff] }
  0x33   :  { %608 = vmatpush.bf16.msrb.mxu1 %v978_v63  ;;  %v1251_v63 = vld [vmem:[%s1827_s3 + $0x1c4] sm:$0xf]  ;;  %v1268_v3 = vld [vmem:[%s1830_s5 + $0x48] sm:$0xff] }
  0x34   :  { %619 = vmatpush.bf16.msrb.mxu2 %v1058_v29  ;;  %v1098_v1 = vor.u32 %v1251_v63, %v1095_v0  ;;  %v1243_v29 = vld [vmem:[%s1827_s3 + $0x184] sm:$0xf]  ;;  %v1270_v63 = vld [vmem:[%s1830_s5 + $0x58] sm:$0xff] }
  0x35   :  { %632 = vmatpush.bf16.msrb.mxu3 %v1122_v30  ;;  %v1063_v30 = vld [vmem:[%s1827_s3 + $0x188] sm:$0xf0] }
  0x36   :  { %596 = vmatpush.bf16.msrb.mxu0 %v906_v8  ;;  %v1231_v8 = vld [vmem:[%s1827_s3 + $0x124] sm:$0xf]  ;;  %v1066_v34 = vor.u32 %v1243_v29, %v1063_v30 }
  0x37   :  { %609 = vmatpush.bf16.msrb.mxu1 %v970_v11  ;;  %v37_v11 = vld [vmem:[%s1828_s2] sm:$0xf]  ;;  %v1018_v13 = vor.u32 %v1231_v8, %v1015_v9  ;;  %v217_v8 = vperm.slane %v215_v6, 0 }
  0x38   :  { %620 = vmatpush.bf16.msrb.mxu2 %v1050_v38  ;;  %v39_v19 = vperm.slane %v37_v11, 0  ;;  %v41_v39 = vperm.slane %v37_v11, 2  ;;  %v42_v40 = vperm.slane %v37_v11, 3 }
  0x39   :  { %633 = vmatpush.bf16.msrb.mxu3 %v1114_v41 }
  0x3a   :  { %597 = vmatpush.bf16.msrb.mxu0 %v898_v20  ;;  %v40_v20 = vperm.slane %v37_v11, 1 }
  0x3b   :  { %610 = vmatpush.bf16.msrb.mxu1 %v962_v25  ;;  %v1227_v25 = vld [vmem:[%s1827_s3 + $0x104] sm:$0xf] }
  0x3c   :  { %621 = vmatpush.bf16.msrb.mxu2 %v1042_v50  ;;  %v1002_v33 = vor.u32 %v1227_v25, %v999_v26 }
  0x3d   :  { %634 = vmatpush.bf16.msrb.mxu3 %v1106_v53  ;;  %v1264_v53 = vld [vmem:[%s1830_s5 + $0x28] sm:$0xff] }
  0x3e   :  { %598 = vmatpush.bf16.msrb.mxu0 %v890_v24 }
  0x3f   :  { %611 = vmatpush.bf16.msrb.mxu1 %v954_v37 }
  0x40   :  { %622 = vmatpush.bf16.msrb.mxu2 %v1034_v62  ;;  %v1271_v62 = vld [vmem:[%s1830_s5 + $0x60] sm:$0xff] }
  0x41   :  { %635 = vmatpush.bf16.msrb.mxu3 %v1098_v1 }
  0x42   :  { %599 = vmatpush.bf16.msrb.mxu0 %v882_v45 }
  0x43   :  { %612 = vmatpush.bf16.msrb.mxu1 %v946_v49 }
  0x44   :  { %623 = vmatpush.bf16.msrb.mxu2 %v1026_v5 }
  0x45   :  { %636 = vmatpush.bf16.msrb.mxu3 %v1090_v7  ;;  %v1267_v7 = vld [vmem:[%s1830_s5 + $0x40] sm:$0xff] }
  0x46   :  { %600 = vmatpush.bf16.msrb.mxu0 %v874_v57  ;;  %v1261_v57 = vld [vmem:[%s1830_s5 + $0x10] sm:$0xff] }
  0x47   :  { %613 = vmatpush.bf16.msrb.mxu1 %v938_v61  ;;  %v1259_v61 = vld [vmem:[%s1830_s5] sm:$0xff] }
  0x48   :  { %624 = vmatpush.bf16.msrb.mxu2 %v1018_v13 }
  0x49   :  { %637 = vmatpush.bf16.msrb.mxu3 %v1082_v14 }
  0x4c   :  { %625 = vmatpush.bf16.msrb.mxu2 %v1010_v21 }
  0x4d   :  { %638 = vmatpush.bf16.msrb.mxu3 %v1074_v22 }
  0x50   :  { %626 = vmatpush.bf16.msrb.mxu2 %v1002_v33 }
  0x51   :  { %639 = vmatpush.bf16.msrb.mxu3 %v1066_v34 }
  0x8e   :  { %v100_v23 = vpop.f32.mrf.mxu2 }
  0x8f   :  { %v101_v27 = vadd.f32 %v100_v23, %v39_v19  ;;  %v113_v28 = vpop.f32.mrf.mxu3 }
  0x90   :  { %v114_v31 = vadd.f32 %v113_v28, %v40_v20  ;;  %v218_v20 = vperm.slane %v215_v6, 1 }
  0x91   :  { %v143_v32 = vmax.f32 %v101_v27, 0.0 }
  0x92   :  { %v144_v24 = vmax.f32 %v114_v31, 0.0 }
  0x93   :  { %v147_v35 = vpack.c.bf16 %v143_v32, %v143_v32 }
  0x94   :  { %v148_v36 = vpack.c.bf16 %v144_v24, %v144_v24 }
  0x95   :  { %549 = vmatmul.bf16.vlgmr.msra.gmra.mxu0 %v147_v35 }
  0x96   :  { %562 = vmatmul.bf16.vlgmr.msra.gmra.mxu1 %v148_v36  ;;  %v102_v37 = vpop.f32.mrf.mxu2  ;;  %781 = vmatpush.bf16.msra.mxu0 %v1266_v51 }
  0x97   :  { %v115_v38 = vpop.f32.mrf.mxu3  ;;  %794 = vmatpush.bf16.msra.mxu1 %v1274_v56 }
  0x9a   :  { %782 = vmatpush.bf16.msra.mxu0 %v1265_v52 }
  0x9b   :  { %795 = vmatpush.bf16.msra.mxu1 %v1273_v58 }
  0x9e   :  { %v126_v41 = vpop.f32.mrf.mxu2  ;;  %783 = vmatpush.bf16.msra.mxu0 %v1264_v53 }
  0x9f   :  { %v127_v42 = vadd.f32 %v126_v41, %v41_v39  ;;  %v139_v43 = vpop.f32.mrf.mxu3  ;;  %796 = vmatpush.bf16.msra.mxu1 %v1272_v60 }
  0xa0   :  { %v140_v44 = vadd.f32 %v139_v43, %v42_v40 }
  0xa1   :  { %v145_v45 = vmax.f32 %v127_v42, 0.0 }
  0xa2   :  { %v146_v46 = vmax.f32 %v140_v44, 0.0  ;;  %784 = vmatpush.bf16.msra.mxu0 %v1263_v54 }
  0xa3   :  { %v149_v47 = vpack.c.bf16 %v145_v45, %v145_v45  ;;  %797 = vmatpush.bf16.msra.mxu1 %v1271_v62 }
  0xa4   :  { %v150_v48 = vpack.c.bf16 %v146_v46, %v146_v46 }
  0xa5   :  { %575 = vmatmul.bf16.vlgmr.msra.gmra.mxu2 %v149_v47  ;;  %601 = vmatmul.bf16.vlgmr.msrb.gmra.mxu0 %v147_v35 }
  0xa6   :  { %588 = vmatmul.bf16.vlgmr.msra.gmra.mxu3 %v150_v48  ;;  %614 = vmatmul.bf16.vlgmr.msrb.gmra.mxu1 %v148_v36  ;;  %v128_v49 = vpop.f32.mrf.mxu2  ;;  %v1275_v36 = vld [vmem:[%s1829_s6] ss:$0 sm:$0xff] }
  0xa7   :  { %v141_v50 = vpop.f32.mrf.mxu3  ;;  %785 = vmatpush.bf16.msra.mxu0 %v1262_v55  ;;  %798 = vmatpush.bf16.msra.mxu1 %v1270_v63 }
  0xab   :  { %786 = vmatpush.bf16.msra.mxu0 %v1261_v57  ;;  %799 = vmatpush.bf16.msra.mxu1 %v1269_v2 }
  0xaf   :  { %787 = vmatpush.bf16.msra.mxu0 %v1260_v59  ;;  %800 = vmatpush.bf16.msra.mxu1 %v1268_v3 }
  0xb3   :  { %788 = vmatpush.bf16.msra.mxu0 %v1259_v61  ;;  %801 = vmatpush.bf16.msra.mxu1 %v1267_v7 }
  0xb5   :  { %627 = vmatmul.bf16.vlgmr.msrb.gmra.mxu2 %v149_v47 }
  0xb6   :  { %640 = vmatmul.bf16.vlgmr.msrb.gmra.mxu3 %v150_v48 }
 0x112   :  { %v550_v0 = vpop.f32.mrf.mxu0 }
 0x113   :  { %v563_v1 = vpop.f32.mrf.mxu1  ;;  %v551_v10 = vadd.f32 %v550_v0, %v217_v8 }
 0x115   :  { %v564_v12 = vadd.f32 %v563_v1, %v551_v10 }
 0x11a   :  { %v552_v4 = vpop.f32.mrf.mxu0 }
 0x11b   :  { %v565_v5 = vpop.f32.mrf.mxu1 }
 0x122   :  { %v602_v9 = vpop.f32.mrf.mxu0 }
 0x123   :  { %v615_v11 = vpop.f32.mrf.mxu1  ;;  %v603_v25 = vadd.f32 %v602_v9, %v218_v20 }
 0x125   :  { %v616_v26 = vadd.f32 %v615_v11, %v603_v25 }
 0x128   :  { %v576_v13 = vpop.f32.mrf.mxu2 }
 0x129   :  { %v577_v14 = vadd.f32 %v576_v13, %v564_v12  ;;  %v589_v15 = vpop.f32.mrf.mxu3 }
 0x12a   :  { %v604_v16 = vpop.f32.mrf.mxu0 }
 0x12b   :  { %v590_v17 = vadd.f32 %v589_v15, %v577_v14  ;;  %v617_v18 = vpop.f32.mrf.mxu1 }
 0x12d   :  { %v645_v19 = vmax.f32 %v590_v17, 0.0 }
 0x12f   :  { %v647_v21 = vpack.c.bf16 %v645_v19, %v645_v19 }
 0x130   :  { %v578_v22 = vpop.f32.mrf.mxu2 }
 0x131   :  { %v591_v23 = vpop.f32.mrf.mxu3  ;;  %789 = vmatmul.bf16.vlgmr.msra.gmra.mxu0 %v647_v21 }
 0x138   :  { %v628_v27 = vpop.f32.mrf.mxu2 }
 0x139   :  { %v629_v28 = vadd.f32 %v628_v27, %v616_v26  ;;  %v641_v29 = vpop.f32.mrf.mxu3 }
 0x13b   :  { %v642_v30 = vadd.f32 %v641_v29, %v629_v28 }
 0x13d   :  { %v646_v31 = vmax.f32 %v642_v30, 0.0 }
 0x13f   :  { %v648_v32 = vpack.c.bf16 %v646_v31, %v646_v31 }
 0x140   :  { %v630_v33 = vpop.f32.mrf.mxu2 }
 0x141   :  { %v643_v24 = vpop.f32.mrf.mxu3  ;;  %802 = vmatmul.bf16.vlgmr.msra.gmra.mxu1 %v648_v32 }
 0x1ae   :  { %v790_v34 = vpop.f32.mrf.mxu0 }
 0x1af   :  { %v791_v37 = vadd.f32 %v1275_v36, %v790_v34 }
 0x1b6   :  { %v792_v35 = vpop.f32.mrf.mxu0 }
 0x1be   :  { %v803_v38 = vpop.f32.mrf.mxu1 }
 0x1bf   :  { %v804_v39 = vadd.f32 %v803_v38, %v791_v37 }
 0x1c1   :  { %v807_v40 = vsub.f32 0.0, %v804_v39 }
 0x1c3   :  { %v808_v41 = vmul.f32 1.442695, %v807_v40 }
 0x1c5   :  { %1276 = vpow2.f32 %v808_v41 }
 0x1c6   :  { %v805_v42 = vpop.f32.mrf.mxu1 }
 0x1cb   :  { %v1277_v43 = vpop.eup %1276 }
 0x1cc   :  { %v810_v44 = vadd.f32 1.0, %v1277_v43 }
 0x1ce   :  { %1278 = vrcp.f32 %v810_v44  ;;  %v822_v48 = vand.u32 2147483648, %v810_v44  ;;  %v820_v50 = vand.u32 2147483647, %v810_v44  ;;  %vm816_vm2 = vweird.f32 %v810_v44 }
 0x1d0   :  { %v823_v52 = vor.u32 1.1754944e-38, %v822_v48  ;;  %vm821_vm5 = vcmp.eq.f32.partialorder %v820_v50, 8.507059e+37 }
 0x1d4   :  { %v1279_v45 = vpop.eup %1278 }
 0x1d5   :  { %v812_v46 = vmul.f32 %v1279_v45, %v810_v44  ;;  %vm817_vm1 = vweird.f32 %v1279_v45 }
 0x1d6   :  { %vm818_vm3 = vmor %vm816_vm2, %vm817_vm1 }
 0x1d7   :  { %v813_v47 = vsub.f32 1.0, %v812_v46 }
 0x1d9   :  { %v814_v49 = vmul.f32 %v1279_v45, %v813_v47 }
 0x1db   :  { %v815_v51 = vadd.f32 %v1279_v45, %v814_v49 }
 0x1dd   :  { %v819_v53 = vsel %vm818_vm3, %v1279_v45, %v815_v51 }
 0x1de   :  { %v824_v54 = vsel %vm821_vm5, %v823_v52, %v819_v53 }
 0x1df   :  { %826 = vst.msk [vmem:[%s1832_s7] sm:$0xff] %vm825_vm4, %v824_v54 }

</bundles_post_ra>
